<compile_context>
chip_gen: v7x
topology: tpu7x:2x2x1
jax: 0.10.0
libtpu: 0.0.40
codegen_flags: <defaults>
</compile_context>

<pallas_src>
import jax
import jax.numpy as jnp
from jax.experimental import pallas as pl
from jax.experimental.pallas import tpu as pltpu

_HID = 128  # padded hidden width (original model uses 100)


def _round_up(n, m):
    return (n + m - 1) // m * m


def _mlp_kernel(x_ref, w1_ref, b1_ref, w2_ref, b2_ref, w3_ref, b3_ref, o_ref):
    # x: (TB, 64) bf16; w1: (64, 128) bf16; w2: (128, 128) bf16  -> MXU, f32 acc
    # b1/b2: (1, 128) f32; w3: (128, 1) f32; b3: (1, 1) f32; out: (1, TB) f32
    x = x_ref[...]

    h1 = jnp.dot(x, w1_ref[...], preferred_element_type=jnp.float32)     # (TB,128)
    h1 = jnp.maximum(h1 + b1_ref[...], 0.0)                              # f32 epilogue

    h2 = jnp.dot(h1.astype(jnp.bfloat16), w2_ref[...],
                 preferred_element_type=jnp.float32)                     # (TB,128)
    h2 = jnp.maximum(h2 + b2_ref[...], 0.0)                              # f32

    # Final 128 -> 1 layer off the MXU: XLU transpose puts the batch in lanes,
    # then VPU multiply + sublane reduce gives a lane-dense (1, TB) result.
    h2t = h2.T                                                           # (128, TB)
    z = jnp.sum(h2t * w3_ref[...], axis=0, keepdims=True) + b3_ref[...]  # (1, TB)

    # Sigmoid on the EUP: exp + approximate reciprocal.
    e = jnp.exp(-z)
    o_ref[...] = pl.reciprocal(1.0 + e, approx=True).astype(o_ref.dtype)


def nn_two_hidden_forward(x, params, *, tb_max=2048):
    """x: (B, 1, 8, 8) / (B, 8, 8) / (B, 64). Returns (B, 1) float32."""
    B = x.shape[0]
    x2d = x.reshape(B, -1).astype(jnp.float32)                           # Flatten
    assert x2d.shape[1] == 64, f"expected 64 flattened features, got {x2d.shape[1]}"

    w1, b1, w2, b2, w3, b3 = params

    # Zero-pad hidden width 100 -> 128 (exact: zero weight + zero bias -> zero
    # activation through ReLU -> zero downstream contribution).
    w1p = jnp.zeros((64, _HID), jnp.bfloat16).at[:, : w1.shape[1]].set(
        w1.astype(jnp.bfloat16))
    b1p = jnp.zeros((1, _HID), jnp.float32).at[:, : b1.shape[1]].set(b1)
    w2p = jnp.zeros((_HID, _HID), jnp.bfloat16).at[: w2.shape[0], : w2.shape[1]].set(
        w2.astype(jnp.bfloat16))
    b2p = jnp.zeros((1, _HID), jnp.float32).at[:, : b2.shape[1]].set(b2)
    w3p = jnp.zeros((_HID, 1), jnp.float32).at[: w3.shape[0], :].set(w3)
    b3p = b3.reshape(1, 1).astype(jnp.float32)

    # Batch tiling: lane-dense tile (multiple of 128); tb_max=2048 keeps the
    # double-buffered working set (2*TB*64 bf16 in + 2*TB f32 out + ~50 KB of
    # padded bf16 weights) well under 1 MiB -> safe on v7x's 64 MiB VMEM.
    TB = min(tb_max, _round_up(B, 128))
    Bp = _round_up(B, TB)
    xb = jnp.zeros((Bp, 64), jnp.bfloat16).at[:B].set(x2d.astype(jnp.bfloat16))

    grid = (Bp // TB,)
    const = lambda a: pl.BlockSpec(a.shape, lambda i: (0,) * a.ndim)

    out = pl.pallas_call(
        _mlp_kernel,
        out_shape=jax.ShapeDtypeStruct((1, Bp), jnp.float32),
        grid=grid,
        in_specs=[
            pl.BlockSpec((TB, 64), lambda i: (i, 0)),   # batch-tiled input
            const(w1p), const(b1p),                      # weights stay resident
            const(w2p), const(b2p),
            const(w3p), const(b3p),
        ],
        out_specs=pl.BlockSpec((1, TB), lambda i: (0, i)),  # lane-dense output
        compiler_params=pltpu.CompilerParams(
            dimension_semantics=("parallel",),
        ),
    )(xb, w1p, b1p, w2p, b2p, w3p, b3p)

    return out.reshape(Bp, 1)[:B]


def init_params(key):
    """PyTorch nn.Linear default init (U[-1/sqrt(in), 1/sqrt(in)]).
    Weights stored transposed: (in_features, out_features)."""
    def linear(key, fan_in, fan_out):
        kw, kb = jax.random.split(key)
        bound = 1.0 / jnp.sqrt(jnp.float32(fan_in))
        w = jax.random.uniform(kw, (fan_in, fan_out), jnp.float32, -bound, bound)
        b = jax.random.uniform(kb, (1, fan_out), jnp.float32, -bound, bound)
        return w, b

    k1, k2, k3 = jax.random.split(key, 3)
    w1, b1 = linear(k1, 64, 100)
    w2, b2 = linear(k2, 100, 100)
    w3, b3 = linear(k3, 100, 1)
    return (w1, b1, w2, b2, w3, b3)


def _reference_forward(x, params):
    """Pure-JAX reference mirroring the kernel's bf16-operand / f32-accum math."""
    B = x.shape[0]
    x2d = x.reshape(B, -1).astype(jnp.float32)
    w1, b1, w2, b2, w3, b3 = params
    xb = x2d.astype(jnp.bfloat16)
    h1 = jnp.maximum(
        jnp.dot(xb, w1.astype(jnp.bfloat16), preferred_element_type=jnp.float32) + b1,
        0.0)
    h2 = jnp.maximum(
        jnp.dot(h1.astype(jnp.bfloat16), w2.astype(jnp.bfloat16),
                preferred_element_type=jnp.float32) + b2,
        0.0)
    z = h2 @ w3 + b3
    return jax.nn.sigmoid(z)


if __name__ == "__main__":
    key = jax.random.PRNGKey(0)
    k_params, k_x = jax.random.split(key)

    params = init_params(k_params)

    # Percolation lattice input: NCHW (B, 1, 8, 8) with values in {0, 1}.
    for B in (8, 200):  # also exercises batch padding to the 128-lane tile
        x = jax.random.bernoulli(jax.random.fold_in(k_x, B), 0.5,
                                 (B, 1, 8, 8)).astype(jnp.float32)
        out = jax.block_until_ready(nn_two_hidden_forward(x, params))
        ref = _reference_forward(x, params)
        assert out.shape == (B, 1)
        assert jnp.allclose(out, ref, atol=2e-3, rtol=2e-3), \
            f"mismatch vs reference at B={B}"

    print("KERNEL_OK")
</pallas_src>

<mosaic_0001>
module attributes {stable_mosaic.version = 11 : i64} {
  func.func @_mlp_kernel(%arg0: i32, %arg1: memref<128x64xbf16, #tpu.memory_space<vmem>>, %arg2: memref<64x128xbf16, #tpu.memory_space<vmem>>, %arg3: memref<1x128xf32, #tpu.memory_space<vmem>>, %arg4: memref<128x128xbf16, #tpu.memory_space<vmem>>, %arg5: memref<1x128xf32, #tpu.memory_space<vmem>>, %arg6: memref<128x1xf32, #tpu.memory_space<vmem>>, %arg7: memref<1x1xf32, #tpu.memory_space<vmem>>, %arg8: memref<1x128xf32, #tpu.memory_space<vmem>>) attributes {dimension_semantics = [#tpu.dimension_semantics<parallel>], iteration_bounds = array<i64: 1>, scalar_prefetch = 0 : i64, scratch_operands = 0 : i64, tpu.core_type = #tpu.core_type<tc>, window_params = [{transform_indices = @transform_0, window_bounds = array<i64: 128, 64>}, {pipeline_mode = #tpu.pipeline_mode<synchronous>, transform_indices = @transform_1, window_bounds = array<i64: 64, 128>}, {pipeline_mode = #tpu.pipeline_mode<synchronous>, transform_indices = @transform_2, window_bounds = array<i64: 1, 128>}, {pipeline_mode = #tpu.pipeline_mode<synchronous>, transform_indices = @transform_3, window_bounds = array<i64: 128, 128>}, {pipeline_mode = #tpu.pipeline_mode<synchronous>, transform_indices = @transform_4, window_bounds = array<i64: 1, 128>}, {pipeline_mode = #tpu.pipeline_mode<synchronous>, transform_indices = @transform_5, window_bounds = array<i64: 128, 1>}, {pipeline_mode = #tpu.pipeline_mode<synchronous>, transform_indices = @transform_6, window_bounds = array<i64: 1, 1>}, {transform_indices = @transform_7, window_bounds = array<i64: 1, 128>}]} {
    %c0 = arith.constant 0 : index
    %c0_0 = arith.constant 0 : index
    %0 = vector.load %arg1[%c0, %c0_0] : memref<128x64xbf16, #tpu.memory_space<vmem>>, vector<128x64xbf16>
    %c0_1 = arith.constant 0 : index
    %c0_2 = arith.constant 0 : index
    %1 = vector.load %arg2[%c0_1, %c0_2] : memref<64x128xbf16, #tpu.memory_space<vmem>>, vector<64x128xbf16>
    %cst = arith.constant dense<0.000000e+00> : vector<128x128xf32>
    %2 = tpu.matmul %0, %1, %cst {dimension_numbers = #tpu.dot_dimension_numbers<[1], [0], [0], [1], [0, 0, 1, 1], [], []>} : vector<128x64xbf16>, vector<64x128xbf16>, vector<128x128xf32> -> vector<128x128xf32>
    %c0_3 = arith.constant 0 : index
    %c0_4 = arith.constant 0 : index
    %3 = vector.load %arg3[%c0_3, %c0_4] : memref<1x128xf32, #tpu.memory_space<vmem>>, vector<1x128xf32>
    %4 = vector.broadcast %3 : vector<1x128xf32> to vector<128x128xf32>
    %5 = arith.addf %2, %4 : vector<128x128xf32>
    %cst_5 = arith.constant 0.000000e+00 : f32
    %6 = vector.broadcast %cst_5 : f32 to vector<128x128xf32>
    %7 = arith.maximumf %5, %6 : vector<128x128xf32>
    %8 = arith.truncf %7 : vector<128x128xf32> to vector<128x128xbf16>
    %c0_6 = arith.constant 0 : index
    %c0_7 = arith.constant 0 : index
    %9 = vector.load %arg4[%c0_6, %c0_7] : memref<128x128xbf16, #tpu.memory_space<vmem>>, vector<128x128xbf16>
    %cst_8 = arith.constant dense<0.000000e+00> : vector<128x128xf32>
    %10 = tpu.matmul %8, %9, %cst_8 {dimension_numbers = #tpu.dot_dimension_numbers<[1], [0], [0], [1], [0, 0, 1, 1], [], []>} : vector<128x128xbf16>, vector<128x128xbf16>, vector<128x128xf32> -> vector<128x128xf32>
    %c0_9 = arith.constant 0 : index
    %c0_10 = arith.constant 0 : index
    %11 = vector.load %arg5[%c0_9, %c0_10] : memref<1x128xf32, #tpu.memory_space<vmem>>, vector<1x128xf32>
    %12 = vector.broadcast %11 : vector<1x128xf32> to vector<128x128xf32>
    %13 = arith.addf %10, %12 : vector<128x128xf32>
    %cst_11 = arith.constant 0.000000e+00 : f32
    %14 = vector.broadcast %cst_11 : f32 to vector<128x128xf32>
    %15 = arith.maximumf %13, %14 : vector<128x128xf32>
    %16 = tpu.transpose %15, [1, 0] : vector<128x128xf32> -> vector<128x128xf32>
    %c0_12 = arith.constant 0 : index
    %c0_13 = arith.constant 0 : index
    %17 = vector.load %arg6[%c0_12, %c0_13] : memref<128x1xf32, #tpu.memory_space<vmem>>, vector<128x1xf32>
    %18 = vector.broadcast %17 : vector<128x1xf32> to vector<128x128xf32>
    %19 = arith.mulf %16, %18 : vector<128x128xf32>
    %cst_14 = arith.constant dense<0.000000e+00> : vector<128xf32>
    %20 = vector.multi_reduction <add>, %19, %cst_14 [0] : vector<128x128xf32> to vector<128xf32>
    %21 = vector.shape_cast %20 : vector<128xf32> to vector<1x128xf32>
    %c0_15 = arith.constant 0 : index
    %c0_16 = arith.constant 0 : index
    %22 = vector.load %arg7[%c0_15, %c0_16] : memref<1x1xf32, #tpu.memory_space<vmem>>, vector<1x1xf32>
    %23 = vector.broadcast %22 : vector<1x1xf32> to vector<1x128xf32>
    %24 = arith.addf %21, %23 : vector<1x128xf32>
    %cst_17 = arith.constant 0.000000e+00 : f32
    %25 = vector.broadcast %cst_17 : f32 to vector<1x128xf32>
    %26 = arith.subf %25, %24 : vector<1x128xf32>
    %27 = math.exp %26 : vector<1x128xf32>
    %cst_18 = arith.constant 1.000000e+00 : f32
    %28 = vector.broadcast %cst_18 : f32 to vector<1x128xf32>
    %29 = arith.addf %28, %27 : vector<1x128xf32>
    %30 = tpu.reciprocal %29 {approx = true} : vector<1x128xf32> -> vector<1x128xf32>
    %c0_19 = arith.constant 0 : index
    %c0_20 = arith.constant 0 : index
    %31 = vector.load %arg8[%c0_19, %c0_20] : memref<1x128xf32, #tpu.memory_space<vmem>>, vector<1x128xf32>
    tpu.vector_store %arg8[%c0_19, %c0_20], %30 {strides = array<i32>} : memref<1x128xf32, #tpu.memory_space<vmem>>, vector<1x128xf32>,
    return
  }
  func.func @transform_0(%arg0: i32) -> (i32, i32) {
    %c0_i32 = arith.constant 0 : i32
    %c0_i32_0 = arith.constant 0 : i32
    return %arg0, %c0_i32 : i32, i32
  }
  func.func @transform_1(%arg0: i32) -> (i32, i32) {
    %c0_i32 = arith.constant 0 : i32
    %c0_i32_0 = arith.constant 0 : i32
    %c0_i32_1 = arith.constant 0 : i32
    return %c0_i32, %c0_i32_0 : i32, i32
  }
  func.func @transform_2(%arg0: i32) -> (i32, i32) {
    %c0_i32 = arith.constant 0 : i32
    %c0_i32_0 = arith.constant 0 : i32
    %c0_i32_1 = arith.constant 0 : i32
    return %c0_i32, %c0_i32_0 : i32, i32
  }
  func.func @transform_3(%arg0: i32) -> (i32, i32) {
    %c0_i32 = arith.constant 0 : i32
    %c0_i32_0 = arith.constant 0 : i32
    %c0_i32_1 = arith.constant 0 : i32
    return %c0_i32, %c0_i32_0 : i32, i32
  }
  func.func @transform_4(%arg0: i32) -> (i32, i32) {
    %c0_i32 = arith.constant 0 : i32
    %c0_i32_0 = arith.constant 0 : i32
    %c0_i32_1 = arith.constant 0 : i32
    return %c0_i32, %c0_i32_0 : i32, i32
  }
  func.func @transform_5(%arg0: i32) -> (i32, i32) {
    %c0_i32 = arith.constant 0 : i32
    %c0_i32_0 = arith.constant 0 : i32
    %c0_i32_1 = arith.constant 0 : i32
    return %c0_i32, %c0_i32_0 : i32, i32
  }
  func.func @transform_6(%arg0: i32) -> (i32, i32) {
    %c0_i32 = arith.constant 0 : i32
    %c0_i32_0 = arith.constant 0 : i32
    %c0_i32_1 = arith.constant 0 : i32
    return %c0_i32, %c0_i32_0 : i32, i32
  }
  func.func @transform_7(%arg0: i32) -> (i32, i32) {
    %c0_i32 = arith.constant 0 : i32
    %c0_i32_0 = arith.constant 0 : i32
    return %c0_i32, %arg0 : i32, i32
  }
}

</mosaic_0001>

<bundles_post_ra>
// kernel: tpu_custom_call.1
= control target key start
LH: loop header
LB: loop body
LE: loop exit
PB: predicated region body
PF: predicated region fallthrough
CT: control target
= control target key end

     0   :  { %s1012_s0 = inlined_call_operand.vmem [shape: bf16[128,64], index: 0, kind: input, shape index: {}]   ;;  %s1013_s1 = inlined_call_operand.vmem [shape: bf16[64,128], index: 1, kind: input, shape index: {}]   ;;  %s1014_s2 = inlined_call_operand.vmem [shape: f32[1,128], index: 2, kind: input, shape index: {}]   ;;  %s1015_s3 = inlined_call_operand.vmem [shape: bf16[128,128], index: 3, kind: input, shape index: {}]   ;;  %s1016_s4 = inlined_call_operand.vmem [shape: f32[1,128], index: 4, kind: input, shape index: {}]   ;;  %s1017_s5 = inlined_call_operand.vmem [shape: f32[128,1], index: 5, kind: input, shape index: {}]   ;;  %s1018_s6 = inlined_call_operand.<no memory space> [shape: f32[1,1], index: 6, kind: input, shape index: {}]   ;;  %s1019_s7 = inlined_call_operand.hbm [shape: f32[1,128], index: 7, kind: output, shape index: {}]  }
   0x1   :  { %v12_v0 = vstv %s1018_s6 }
   0x2   :  { %13 = vst [vmem:[#allocation2] sm:$0x1] %v12_v0 }
   0x3   :  { %v785_v1 = vld [vmem:[%s1013_s1] sm:$0xff]   ;;  %v786_v2 = vld [vmem:[%s1013_s1 + $0x8] sm:$0xff]   ;;  %v787_v3 = vld [vmem:[%s1013_s1 + $0x10] sm:$0xff]   ;;  %vm125_vm0 = vcmask 523264  }
   0x4   :  { %709 = vmatprep.subr.bf16.mxu0 %v785_v1  ;;  %v789_v4 = vld [vmem:[%s1012_s0] sm:$0xff]   ;;  %v788_v5 = vld [vmem:[%s1013_s1 + $0x18] sm:$0xff]   ;;  %v790_v7 = vld [vmem:[%s1012_s0 + $0x8] sm:$0xff]  }
   0x5   :  { %710 = vmatpush3.bf16.msra.mxu0 %v785_v1  ;;  %717 = vmatprep.mubr.msk.bf16.mxu0 %vm125_vm0, %v789_v4  ;;  %v797_v6 = vld [vmem:[%s1015_s3] sm:$0xff]   ;;  %v798_v8 = vld [vmem:[%s1015_s3 + $0x8] sm:$0xff]   ;;  %v791_v9 = vld [vmem:[%s1012_s0 + $0x10] sm:$0xff]  }
   0x6   :  { %711 = vmatprep.subr.bf16.mxu0 %v786_v2  ;;  %765 = vmatprep.subr.bf16.mxu1 %v797_v6  ;;  %v799_v10 = vld [vmem:[%s1015_s3 + $0x10] sm:$0xff]  }
   0x7   :  { %773 = vmatpush3.bf16.msra.mxu1 %v797_v6 }
   0x8   :  { %766 = vmatprep.subr.bf16.mxu1 %v798_v8 }
   0x9   :  { %712 = vmatpush3.bf16.msra.mxu0 %v786_v2 }
   0xa   :  { %713 = vmatprep.subr.bf16.mxu0 %v787_v3 }
   0xd   :  { %714 = vmatpush3.bf16.msra.mxu0 %v787_v3 }
   0xe   :  { %715 = vmatprep.subr.bf16.mxu0 %v788_v5 }
  0x11   :  { %716 = vmatpush3.bf16.msra.mxu0 %v788_v5 }
  0x12   :  { %733 = vmatprep.subr.bf16.mxu0 %v797_v6 }
  0x14   :  { %718 = vmatmul.mubr.msk.bf16.vlgmr.msra.gmra.mrb[0].mxu0 %vm125_vm0, %v790_v7 }
  0x15   :  { %721 = vmatprep.mubr.msk.bf16.mxu0 %vm125_vm0, %v791_v9  ;;  %734 = vmatpush3.bf16.msra.mxu0 %v797_v6 }
  0x16   :  { %14 = vsyncpa [#allocation4], 0  ;;  %735 = vmatprep.subr.bf16.mxu0 %v798_v8  ;;  %774 = vmatpush3.bf16.msra.mxu1 %v798_v8  ;;  %v792_v11 = vld [vmem:[%s1012_s0 + $0x18] sm:$0xff]   ;;  %v793_v12 = vld [vmem:[%s1012_s0 + $0x20] sm:$0xff]   ;;  %v833_v22 = vmov 0  }
  0x17   :  { %767 = vmatprep.subr.bf16.mxu1 %v799_v10  ;;  %v800_v13 = vld [vmem:[%s1015_s3 + $0x18] sm:$0xff]   ;;  %v801_v14 = vld [vmem:[%s1015_s3 + $0x20] sm:$0xff]   ;;  %v794_v15 = vld [vmem:[%s1012_s0 + $0x28] sm:$0xff]   ;;  %784 = vset.pattern.permute.xlu1 %v833_v22 }
  0x18   :  { %v795_v16 = vld [vmem:[%s1012_s0 + $0x30] sm:$0xff]   ;;  %v802_v17 = vld [vmem:[%s1015_s3 + $0x28] sm:$0xff]   ;;  %v796_v18 = vld [vmem:[%s1012_s0 + $0x38] sm:$0xff]   ;;  %783 = vset.pattern.permute.xlu0 %v833_v22 }
  0x19   :  { %736 = vmatpush3.bf16.msra.mxu0 %v798_v8  ;;  %v803_v19 = vld [vmem:[%s1015_s3 + $0x30] sm:$0xff]   ;;  %v804_v20 = vld [vmem:[%s1015_s3 + $0x38] sm:$0xff]   ;;  %v487_v23 = vld [vmem:[%s1017_s5] sm:$0xff] }
  0x1a   :  { %737 = vmatprep.subr.bf16.mxu0 %v799_v10  ;;  %775 = vmatpush3.bf16.msra.mxu1 %v799_v10  ;;  %v489_v21 = vld [vmem:[%s1017_s5 + $0x10] sm:$0xff]  ;;  %v490_v24 = vld [vmem:[%s1017_s5 + $0x18] sm:$0xff]  ;;  %v492_v25 = vld [vmem:[%s1017_s5 + $0x28] sm:$0xff] }
  0x1b   :  { %768 = vmatprep.subr.bf16.mxu1 %v800_v13  ;;  %515 = vperm.xlu1 %784, %v489_v21   ;;  %v494_v26 = vld [vmem:[%s1017_s5 + $0x38] sm:$0xff]  ;;  %v496_v27 = vld [vmem:[%s1017_s5 + $0x48] sm:$0xff]  ;;  %v651_v30 = vld [vmem:[%s1014_s2] ss:$0 sm:$0xff] }
  0x1c   :  { %722 = vmatmul.mubr.msk.bf16.gmra.mrb[4].mxu0 %vm125_vm0, %v792_v11  ;;  %505 = vperm.xlu0 %783, %v487_v23   ;;  %v498_v28 = vld [vmem:[%s1017_s5 + $0x58] sm:$0xff]  ;;  %v500_v29 = vld [vmem:[%s1017_s5 + $0x68] sm:$0xff] }
  0x1d   :  { %725 = vmatprep.mubr.msk.bf16.mxu0 %vm125_vm0, %v793_v12  ;;  %738 = vmatpush3.bf16.msra.mxu0 %v799_v10  ;;  %v488_v23 = vld [vmem:[%s1017_s5 + $0x8] sm:$0xff] }
  0x1e   :  { %739 = vmatprep.subr.bf16.mxu0 %v800_v13  ;;  %776 = vmatpush3.bf16.msra.mxu1 %v800_v13 }
  0x1f   :  { %769 = vmatprep.subr.bf16.mxu1 %v801_v14  ;;  %520 = vperm.xlu1 %784, %v490_v24   ;;  %v491_v24 = vld [vmem:[%s1017_s5 + $0x20] sm:$0xff] }
  0x20   :  { %510 = vperm.xlu0 %783, %v488_v23  }
  0x21   :  { %740 = vmatpush3.bf16.msra.mxu0 %v800_v13 }
  0x22   :  { %741 = vmatprep.subr.bf16.mxu0 %v801_v14  ;;  %777 = vmatpush3.bf16.msra.mxu1 %v801_v14 }
  0x23   :  { %770 = vmatprep.subr.bf16.mxu1 %v802_v17  ;;  %530 = vperm.xlu1 %784, %v492_v25   ;;  %v493_v25 = vld [vmem:[%s1017_s5 + $0x30] sm:$0xff] }
  0x24   :  { %726 = vmatmul.mubr.msk.bf16.gmra.mrb[8].mxu0 %vm125_vm0, %v794_v15  ;;  %525 = vperm.xlu0 %783, %v491_v24  }
  0x25   :  { %729 = vmatprep.mubr.msk.bf16.mxu0 %vm125_vm0, %v795_v16  ;;  %742 = vmatpush3.bf16.msra.mxu0 %v801_v14 }
  0x26   :  { %743 = vmatprep.subr.bf16.mxu0 %v802_v17  ;;  %778 = vmatpush3.bf16.msra.mxu1 %v802_v17 }
  0x27   :  { %771 = vmatprep.subr.bf16.mxu1 %v803_v19  ;;  %540 = vperm.xlu1 %784, %v494_v26   ;;  %v495_v26 = vld [vmem:[%s1017_s5 + $0x40] sm:$0xff] }
  0x28   :  { %535 = vperm.xlu0 %783, %v493_v25  }
  0x29   :  { %744 = vmatpush3.bf16.msra.mxu0 %v802_v17 }
  0x2a   :  { %745 = vmatprep.subr.bf16.mxu0 %v803_v19  ;;  %779 = vmatpush3.bf16.msra.mxu1 %v803_v19 }
  0x2b   :  { %772 = vmatprep.subr.bf16.mxu1 %v804_v20  ;;  %550 = vperm.xlu1 %784, %v496_v27   ;;  %v497_v27 = vld [vmem:[%s1017_s5 + $0x50] sm:$0xff] }
  0x2c   :  { %730 = vmatmul.mubr.msk.bf16.gmra.mrb[12].mxu0 %vm125_vm0, %v796_v18  ;;  %545 = vperm.xlu0 %783, %v495_v26  }
  0x2d   :  { %746 = vmatpush3.bf16.msra.mxu0 %v803_v19 }
  0x2e   :  { %747 = vmatprep.subr.bf16.mxu0 %v804_v20  ;;  %780 = vmatpush3.bf16.msra.mxu1 %v804_v20 }
  0x2f   :  { %560 = vperm.xlu1 %784, %v498_v28   ;;  %v499_v28 = vld [vmem:[%s1017_s5 + $0x60] sm:$0xff] }
  0x30   :  { %555 = vperm.xlu0 %783, %v497_v27  }
  0x31   :  { %748 = vmatpush3.bf16.msra.mxu0 %v804_v20 }
  0x33   :  { %570 = vperm.xlu1 %784, %v500_v29   ;;  %v501_v29 = vld [vmem:[%s1017_s5 + $0x70] sm:$0xff] }
  0x34   :  { %565 = vperm.xlu0 %783, %v499_v28  }
  0x38   :  { %575 = vperm.xlu0 %783, %v501_v29  }
  0x9b   :  { %v506_v27 = vpop.permute.xlu0 %505 }
  0xe7   :  { %v719_v31 = vpop.f32.mrb[0].mxu0 }
  0xe8   :  { %v193_v32 = vadd.f32 %v719_v31, %v651_v30  ;;  %v184_v33 = vpop.f32.mrb[1].mxu0  ;;  %v620_v31 = vld [vmem:[#allocation2] sm:$0x1] }
  0xe9   :  { %v185_v34 = vadd.f32 %v651_v30, %v184_v33  ;;  %v720_v35 = vpop.f32.mrb[2].mxu0 }
  0xea   :  { %v196_v36 = vadd.f32 %v720_v35, %v651_v30  ;;  %v187_v37 = vpop.f32.mrb[3].mxu0  ;;  %v249_v39 = vmax.f32 %v193_v32, 0.0  ;;  %v672_v32 = vld [vmem:[%s1016_s4] ss:$0 sm:$0xff]  ;;  %s834_s4 = smov [#allocation3]  }
  0xeb   :  { %v188_v38 = vadd.f32 %v651_v30, %v187_v37  ;;  %v247_v41 = vmax.f32 %v185_v34, 0.0 }
  0xec   :  { %v250_v40 = vmax.f32 %v196_v36, 0.0 }
  0xed   :  { %v248_v42 = vmax.f32 %v188_v38, 0.0 }
  0xee   :  { %v264_v43 = vpack.c.bf16 %v250_v40, %v249_v39 }
  0xef   :  { %v263_v44 = vpack.c.bf16 %v248_v42, %v247_v41  ;;  %v723_v45 = vpop.f32.mrb[4].mxu0 }
  0xf0   :  { %v209_v46 = vadd.f32 %v723_v45, %v651_v30  ;;  %v200_v47 = vpop.f32.mrb[5].mxu0 }
  0xf1   :  { %v201_v48 = vadd.f32 %v651_v30, %v200_v47  ;;  %749 = vmatprep.mubr.bf16.mxu0 %v263_v44  ;;  %v724_v49 = vpop.f32.mrb[6].mxu0 }
  0xf2   :  { %v253_v50 = vmax.f32 %v209_v46, 0.0  ;;  %v212_v51 = vadd.f32 %v724_v49, %v651_v30  ;;  %750 = vmatmul.mubr.bf16.vlgmr.msra.gmra.mrb[16].mxu0 %v264_v43  ;;  %v203_v52 = vpop.f32.mrb[7].mxu0 }
  0xf3   :  { %v251_v53 = vmax.f32 %v201_v48, 0.0  ;;  %v204_v54 = vadd.f32 %v651_v30, %v203_v52 }
  0xf4   :  { %v254_v55 = vmax.f32 %v212_v51, 0.0 }
  0xf5   :  { %v252_v56 = vmax.f32 %v204_v54, 0.0 }
  0xf6   :  { %v266_v57 = vpack.c.bf16 %v254_v55, %v253_v50 }
  0xf7   :  { %v265_v58 = vpack.c.bf16 %v252_v56, %v251_v53  ;;  %v727_v59 = vpop.f32.mrb[8].mxu0 }
  0xf8   :  { %v225_v60 = vadd.f32 %v727_v59, %v651_v30  ;;  %v216_v61 = vpop.f32.mrb[9].mxu0 }
  0xf9   :  { %753 = vmatprep.mubr.bf16.mxu1 %v265_v58  ;;  %v217_v62 = vadd.f32 %v651_v30, %v216_v61  ;;  %v728_v63 = vpop.f32.mrb[10].mxu0 }
  0xfa   :  { %754 = vmatmul.mubr.bf16.vlgmr.msra.gmra.mrb[0].mxu1 %v266_v57  ;;  %v257_v0 = vmax.f32 %v225_v60, 0.0  ;;  %v228_v1 = vadd.f32 %v728_v63, %v651_v30  ;;  %v219_v2 = vpop.f32.mrb[11].mxu0 }
  0xfb   :  { %v255_v3 = vmax.f32 %v217_v62, 0.0  ;;  %v220_v4 = vadd.f32 %v651_v30, %v219_v2 }
  0xfc   :  { %v258_v5 = vmax.f32 %v228_v1, 0.0 }
  0xfd   :  { %v256_v6 = vmax.f32 %v220_v4, 0.0 }
  0xfe   :  { %v268_v7 = vpack.c.bf16 %v258_v5, %v257_v0 }
  0xff   :  { %v267_v8 = vpack.c.bf16 %v256_v6, %v255_v3  ;;  %v731_v9 = vpop.f32.mrb[12].mxu0 }
 0x100   :  { %v241_v10 = vadd.f32 %v731_v9, %v651_v30  ;;  %v232_v11 = vpop.f32.mrb[13].mxu0 }
 0x101   :  { %757 = vmatprep.mubr.bf16.mxu1 %v267_v8  ;;  %v233_v12 = vadd.f32 %v651_v30, %v232_v11  ;;  %v732_v13 = vpop.f32.mrb[14].mxu0 }
 0x102   :  { %758 = vmatmul.mubr.bf16.gmra.mrb[4].mxu1 %v268_v7  ;;  %v261_v14 = vmax.f32 %v241_v10, 0.0  ;;  %v244_v15 = vadd.f32 %v732_v13, %v651_v30  ;;  %v235_v16 = vpop.f32.mrb[15].mxu0 }
 0x103   :  { %v259_v17 = vmax.f32 %v233_v12, 0.0  ;;  %v236_v18 = vadd.f32 %v651_v30, %v235_v16  ;;  %v502_v30 = vld [vmem:[%s1017_s5 + $0x78] sm:$0xff]  ;;  %s643_s5 = sshll.u32 %s834_s4, 4  ;;  %s644_s5 = int_to_ptr.vmem [resolvable:$true] %s643_s5 }
 0x104   :  { %v262_v19 = vmax.f32 %v244_v15, 0.0  ;;  %580 = vperm.xlu0 %783, %v502_v30   ;;  %v511_v30 = vpop.permute.xlu0 %510  ;;  %s809_s22 = scalar_lea.vmem %s644_s5, 16  ;;  %s813_s23 = scalar_lea.vmem %s644_s5, 32 }
 0x105   :  { %v260_v20 = vmax.f32 %v236_v18, 0.0  ;;  %p810_p0 = scmp.ne.s32.totalorder %s644_s5, %s809_s22  ;;  %p814_p1 = scmp.lt.s32.totalorder %s644_s5, %s644_s5 }
 0x106   :  { %v270_v21 = vpack.c.bf16 %v262_v19, %v261_v14  ;;  %p815_p2 = scmp.lt.s32.totalorder %s813_s23, %s809_s22 }
 0x107   :  { %v269_v22 = vpack.c.bf16 %v260_v20, %v259_v17  ;;  %v516_v17 = vpop.permute.xlu1 %515 }
 0x108   :  { %623 = vperm.xlu0 %783, %v620_v31   ;;  %p816_p3 = por %p815_p2, %p814_p1 }
 0x109   :  { %761 = vmatprep.mubr.bf16.mxu1 %v269_v22 }
 0x10a   :  { %762 = vmatmul.mubr.bf16.gmra.mrb[8].mxu1 %v270_v21  ;;  %p817_p4 = pnand %p816_p3, %p810_p0 }
 0x10b   :  { %v521_v18 = vpop.permute.xlu1 %520 }
 0x10f   :  { %v531_v19 = vpop.permute.xlu1 %530 }
 0x113   :  { %v541_v20 = vpop.permute.xlu1 %540 }
 0x117   :  { %v551_v21 = vpop.permute.xlu1 %550 }
 0x11b   :  { %v561_v22 = vpop.permute.xlu1 %560 }
 0x11f   :  { %v571_v23 = vpop.permute.xlu1 %570 }
 0x1c5   :  { %v751_v33 = vpop.f32.mrb[16].mxu0 }
 0x1c6   :  { %v376_v34 = vpop.f32.mrb[17].mxu0  ;;  %v385_v40 = vadd.f32 %v751_v33, %v672_v32  ;;  %v526_v33 = vpop.permute.xlu0 %525 }
 0x1c7   :  { %v377_v35 = vadd.f32 %v672_v32, %v376_v34  ;;  %v752_v36 = vpop.f32.mrb[18].mxu0 }
 0x1c8   :  { %v379_v37 = vpop.f32.mrb[19].mxu0  ;;  %v441_v46 = vmax.f32 %v385_v40, 0.0  ;;  %v388_v47 = vadd.f32 %v752_v36, %v672_v32 }
 0x1c9   :  { %v439_v38 = vmax.f32 %v377_v35, 0.0  ;;  %v380_v39 = vadd.f32 %v672_v32, %v379_v37 }
 0x1ca   :  { %v442_v48 = vmax.f32 %v388_v47, 0.0  ;;  %v536_v35 = vpop.permute.xlu0 %535 }
 0x1cb   :  { %455 = vxpose.xlu1.b32.start [1/16] %v439_v38, 128  ;;  %v440_v41 = vmax.f32 %v380_v39, 0.0 }
 0x1cd   :  { %v755_v42 = vpop.f32.mrb[0].mxu1 }
 0x1ce   :  { %v392_v43 = vpop.f32.mrb[1].mxu1  ;;  %v401_v56 = vadd.f32 %v755_v42, %v672_v32  ;;  %v546_v42 = vpop.permute.xlu0 %545 }
 0x1cf   :  { %456 = vxpose.xlu1.b32.cont [2/16] %v440_v41, 128  ;;  %v756_v44 = vpop.f32.mrb[2].mxu1  ;;  %v393_v49 = vadd.f32 %v672_v32, %v392_v43 }
 0x1d0   :  { %v395_v45 = vpop.f32.mrb[3].mxu1  ;;  %v445_v62 = vmax.f32 %v401_v56, 0.0  ;;  %v404_v63 = vadd.f32 %v756_v44, %v672_v32 }
 0x1d1   :  { %v443_v54 = vmax.f32 %v393_v49, 0.0  ;;  %v396_v55 = vadd.f32 %v672_v32, %v395_v45 }
 0x1d2   :  { %v446_v0 = vmax.f32 %v404_v63, 0.0 }
 0x1d3   :  { %457 = vxpose.xlu1.b32.cont [3/16] %v441_v46, 128  ;;  %v444_v57 = vmax.f32 %v396_v55, 0.0 }
 0x1d5   :  { %v759_v50 = vpop.f32.mrb[4].mxu1 }
 0x1d6   :  { %v408_v51 = vpop.f32.mrb[5].mxu1  ;;  %v417_v4 = vadd.f32 %v759_v50, %v672_v32 }
 0x1d7   :  { %458 = vxpose.xlu1.b32.cont [4/16] %v442_v48, 128  ;;  %v760_v52 = vpop.f32.mrb[6].mxu1  ;;  %v409_v1 = vadd.f32 %v672_v32, %v408_v51  ;;  %v556_v51 = vpop.permute.xlu0 %555 }
 0x1d8   :  { %v411_v53 = vpop.f32.mrb[7].mxu1  ;;  %v449_v6 = vmax.f32 %v417_v4, 0.0  ;;  %v420_v7 = vadd.f32 %v760_v52, %v672_v32 }
 0x1d9   :  { %v447_v2 = vmax.f32 %v409_v1, 0.0  ;;  %v412_v3 = vadd.f32 %v672_v32, %v411_v53 }
 0x1da   :  { %v450_v8 = vmax.f32 %v420_v7, 0.0 }
 0x1db   :  { %459 = vxpose.xlu1.b32.cont [5/16] %v443_v54, 128  ;;  %v448_v5 = vmax.f32 %v412_v3, 0.0 }
 0x1dd   :  { %v763_v58 = vpop.f32.mrb[8].mxu1 }
 0x1de   :  { %v424_v59 = vpop.f32.mrb[9].mxu1  ;;  %v433_v12 = vadd.f32 %v763_v58, %v672_v32 }
 0x1df   :  { %460 = vxpose.xlu1.b32.cont [6/16] %v444_v57, 128  ;;  %v764_v60 = vpop.f32.mrb[10].mxu1  ;;  %v425_v9 = vadd.f32 %v672_v32, %v424_v59  ;;  %v566_v59 = vpop.permute.xlu0 %565 }
 0x1e0   :  { %v427_v61 = vpop.f32.mrb[11].mxu1  ;;  %v453_v14 = vmax.f32 %v433_v12, 0.0  ;;  %v436_v15 = vadd.f32 %v764_v60, %v672_v32 }
 0x1e1   :  { %v451_v10 = vmax.f32 %v425_v9, 0.0  ;;  %v428_v11 = vadd.f32 %v672_v32, %v427_v61 }
 0x1e2   :  { %v454_v16 = vmax.f32 %v436_v15, 0.0  ;;  %v626_v15 = vlaneseq }
 0x1e3   :  { %461 = vxpose.xlu1.b32.cont [7/16] %v445_v62, 128  ;;  %v452_v13 = vmax.f32 %v428_v11, 0.0  ;;  %v576_v4 = vpop.permute.xlu0 %575 }
 0x1e7   :  { %462 = vxpose.xlu1.b32.cont [8/16] %v446_v0, 128  ;;  %v581_v11 = vpop.permute.xlu0 %580 }
 0x1eb   :  { %463 = vxpose.xlu1.b32.cont [9/16] %v447_v2, 128 }
 0x1ef   :  { %464 = vxpose.xlu1.b32.cont [10/16] %v448_v5, 128 }
 0x1f3   :  { %465 = vxpose.xlu1.b32.cont [11/16] %v449_v6, 128 }
 0x1f7   :  { %466 = vxpose.xlu1.b32.cont [12/16] %v450_v8, 128 }
 0x1fb   :  { %467 = vxpose.xlu1.b32.cont [13/16] %v451_v10, 128 }
 0x1ff   :  { %468 = vxpose.xlu1.b32.cont [14/16] %v452_v13, 128 }
 0x203   :  { %469 = vxpose.xlu1.b32.cont [15/16] %v453_v14, 128 }
 0x207   :  { %470 = vxpose.xlu1.b32.end [16/16] %v454_v16, 128 }
 0x24b   :  { %v471_v24 = vpop.trf.xlu1 }
 0x24c   :  { %v583_v38 = vmul.f32 %v506_v27, %v471_v24  ;;  %v624_v24 = vpop.permute.xlu0 %623 }
 0x24f   :  { %v472_v25 = vpop.trf.xlu1 }
 0x250   :  { %v584_v36 = vmul.f32 %v511_v30, %v472_v25 }
 0x252   :  { %v599_v40 = vadd.f32 %v584_v36, %v583_v38 }
 0x253   :  { %v473_v26 = vpop.trf.xlu1 }
 0x254   :  { %v585_v39 = vmul.f32 %v516_v17, %v473_v26 }
 0x256   :  { %v600_v44 = vadd.f32 %v599_v40, %v585_v39 }
 0x257   :  { %v474_v28 = vpop.trf.xlu1 }
 0x258   :  { %v586_v41 = vmul.f32 %v521_v18, %v474_v28  ;;  %v627_v18 = vshrl.u32 %v626_v15, 7 }
 0x25a   :  { %v601_v46 = vadd.f32 %v600_v44, %v586_v41 }
 0x25b   :  { %v475_v29 = vpop.trf.xlu1 }
 0x25c   :  { %v587_v45 = vmul.f32 %v526_v33, %v475_v29 }
 0x25e   :  { %v602_v49 = vadd.f32 %v601_v46, %v587_v45 }
 0x25f   :  { %v476_v31 = vpop.trf.xlu1 }
 0x260   :  { %v588_v47 = vmul.f32 %v531_v19, %v476_v31 }
 0x262   :  { %v603_v52 = vadd.f32 %v602_v49, %v588_v47 }
 0x263   :  { %v477_v32 = vpop.trf.xlu1 }
 0x264   :  { %v589_v50 = vmul.f32 %v536_v35, %v477_v32 }
 0x266   :  { %v604_v55 = vadd.f32 %v603_v52, %v589_v50 }
 0x267   :  { %v478_v34 = vpop.trf.xlu1 }
 0x268   :  { %v590_v53 = vmul.f32 %v541_v20, %v478_v34 }
 0x26a   :  { %v605_v57 = vadd.f32 %v604_v55, %v590_v53 }
 0x26b   :  { %v479_v37 = vpop.trf.xlu1 }
 0x26c   :  { %v591_v56 = vmul.f32 %v546_v42, %v479_v37 }
 0x26e   :  { %v606_v61 = vadd.f32 %v605_v57, %v591_v56 }
 0x26f   :  { %v480_v43 = vpop.trf.xlu1 }
 0x270   :  { %v592_v58 = vmul.f32 %v551_v21, %v480_v43  ;;  %v628_v21 = vsub.s32 0, %v627_v18 }
 0x272   :  { %v607_v63 = vadd.f32 %v606_v61, %v592_v58  ;;  %v629_v26 = vrot.slane %v624_v24, %v628_v21 }
 0x273   :  { %v481_v48 = vpop.trf.xlu1 }
 0x274   :  { %v593_v62 = vmul.f32 %v556_v51, %v481_v48 }
 0x276   :  { %v608_v2 = vadd.f32 %v607_v63, %v593_v62 }
 0x277   :  { %v482_v54 = vpop.trf.xlu1 }
 0x278   :  { %v594_v0 = vmul.f32 %v561_v22, %v482_v54 }
 0x27a   :  { %v609_v5 = vadd.f32 %v608_v2, %v594_v0 }
 0x27b   :  { %v483_v60 = vpop.trf.xlu1 }
 0x27c   :  { %v595_v3 = vmul.f32 %v566_v59, %v483_v60 }
 0x27e   :  { %v610_v8 = vadd.f32 %v609_v5, %v595_v3 }
 0x27f   :  { %v484_v1 = vpop.trf.xlu1 }
 0x280   :  { %v596_v6 = vmul.f32 %v571_v23, %v484_v1 }
 0x282   :  { %v611_v10 = vadd.f32 %v610_v8, %v596_v6 }
 0x283   :  { %v485_v7 = vpop.trf.xlu1 }
 0x284   :  { %v597_v9 = vmul.f32 %v576_v4, %v485_v7 }
 0x286   :  { %v612_v13 = vadd.f32 %v611_v10, %v597_v9 }
 0x287   :  { %v486_v12 = vpop.trf.xlu1 }
 0x288   :  { %v598_v14 = vmul.f32 %v581_v11, %v486_v12 }
 0x28a   :  { %v613_v16 = vadd.f32 %v612_v13, %v598_v14 }
 0x28c   :  { %v614_v17 = vrot.slane %v613_v16, 4 }
 0x28e   :  { %v615_v19 = vadd.f32 %v614_v17, %v613_v16 }
 0x290   :  { %v616_v20 = vrot.slane %v615_v19, 2 }
 0x292   :  { %v617_v22 = vadd.f32 %v616_v20, %v615_v19 }
 0x294   :  { %v618_v25 = vrot.slane %v617_v22, 1 }
 0x296   :  { %v619_v23 = vadd.f32 %v618_v25, %v617_v22 }
 0x298   :  { %v630_v27 = vadd.f32 %v629_v26, %v619_v23 }
 0x29a   :  { %v631_v28 = vsub.f32 0.0, %v630_v27 }
 0x29c   :  { %v632_v29 = vmul.f32 1.442695, %v631_v28 }
 0x29e   :  { %805 = vpow2.f32 %v632_v29 }
 0x2a8   :  { %v806_v30 = vpop.eup %805 }
 0x2a9   :  { %v634_v31 = vadd.f32 1.0, %v806_v30 }
 0x2ab   :  { %807 = vrcp.f32 %v634_v31 }
 0x2b5   :  { %v808_v33 = vpop.eup %807 }
 0x2b6   :  { %636 = vst [vmem:[#allocation3] sm:$0x1] %v808_v33 }
 0x2b7   :  { %820 = shalt.err (!%p817_p4)
}
 0x2b8   :  { %s821_s26 = scalar_lea.hbm %s1019_s7, 16 }
 0x2b9   :  { %p822_p5 = scmp.ne.s32.totalorder %s1019_s7, %s821_s26  ;;  %p825_p6 = scmp.lt.u32.totalorder %s821_s26, %s1019_s7 }
 0x2bb   :  { %p827_p7 = pnand %p825_p6, %p822_p5 }
 0x2bd   :  { %830 = shalt.err (!%p827_p7)
}
 0x2be   :  { %646 = dma.vmem_to_hbm [thread:$0]  %s644_s5, 16, %s1019_s7, [#allocation4]  }
 0x2bf   :  { %831 = dma.done.wait [#allocation4], 16  }
 0x2c0   :  { %832 = vsyncadd [#allocation4], 4294967280 }
 0x2c1   :  { %650 = vsyncpa [#allocation4], 1 }

</bundles_post_ra>
